<compile_context>
chip_gen: v6e
topology: v6e:2x2x1
jax: 0.10.0
libtpu: 0.0.40
codegen_flags: <defaults>
</compile_context>

<pallas_src>
import jax
import jax.numpy as jnp
from jax.experimental import pallas as pl
from jax.experimental.pallas import tpu as pltpu

_INV_SCALE = 1.0 / 22.8  # compile-time constant (replaces per-element divide)


def _custom_loss_kernel(mu_ref, y_ref, ye_ref, f_ref, l0_ref, l2_ref,
                        acc_l0, acc_l2):
    t = pl.program_id(1)
    nt = pl.num_programs(1)

    @pl.when(t == 0)
    def _init():
        acc_l0[...] = jnp.zeros_like(acc_l0)
        acc_l2[...] = jnp.zeros_like(acc_l2)

    # scalar reciprocal hoisted out of the per-element math
    inv_mu = 1.0 / mu_ref[0, 0]

    # ---- pseudo l0-norm term (fused: min(|y|/mu, 1)) ---------------------
    ay = jnp.abs(y_ref[...].astype(jnp.float32))
    acc_l0[...] += jnp.minimum(ay * inv_mu, jnp.float32(1.0))

    # ---- l2 term: trace(|diff| @ |diff|^T) == sum(diff^2) ----------------
    diff = (ye_ref[...].astype(jnp.float32) * jnp.float32(_INV_SCALE)
            - f_ref[...].astype(jnp.float32))
    acc_l2[...] += diff * diff

    @pl.when(t == nt - 1)
    def _finalize():
        # one cross-lane reduction per core; broadcast the partial into the
        # lane-dense (1, 8, 128) output block (wrapper reads [c, 0, 0]).
        l0_ref[...] = jnp.full(l0_ref.shape, jnp.sum(acc_l0[...]), jnp.float32)
        l2_ref[...] = jnp.full(l2_ref.shape, jnp.sum(acc_l2[...]), jnp.float32)


def custom_loss(y, y_echo, f, mu, *, tile_n=512):
    """Returns (pseudo_l0_loss, l2_loss), matching CustomLoss.forward."""
    B, N = y.shape
    M, N2 = y_echo.shape
    assert N2 == N and f.shape == (M, N)

    mu_arr = jnp.asarray(mu, jnp.float32).reshape(1, 1)

    # --- choose N tiling (zero padding is loss-neutral for both terms) ----
    tn = N if N <= tile_n else tile_n
    n_pad = pl.cdiv(N, tn) * tn
    if n_pad != N:
        pad = n_pad - N
        y = jnp.pad(y, ((0, 0), (0, pad)))
        y_echo = jnp.pad(y_echo, ((0, 0), (0, pad)))
        f = jnp.pad(f, ((0, 0), (0, pad)))
    n_tiles = n_pad // tn

    # Outer "parallel" axis: on v7x each TensorCore reduces half of the tiles.
    n_splits = 2 if (n_tiles >= 2 and n_tiles % 2 == 0) else 1
    tiles_per_split = n_tiles // n_splits

    def n_map(c, t):
        return (0, c * tiles_per_split + t)

    l0_out, l2_out = pl.pallas_call(
        _custom_loss_kernel,
        grid=(n_splits, tiles_per_split),
        in_specs=[
            pl.BlockSpec(memory_space=pltpu.MemorySpace.SMEM),  # mu scalar
            pl.BlockSpec((B, tn), n_map),                       # y
            pl.BlockSpec((M, tn), n_map),                       # y_echo
            pl.BlockSpec((M, tn), n_map),                       # f
        ],
        out_specs=(
            pl.BlockSpec((1, 8, 128), lambda c, t: (c, 0, 0)),  # l0 partials
            pl.BlockSpec((1, 8, 128), lambda c, t: (c, 0, 0)),  # l2 partials
        ),
        out_shape=(
            jax.ShapeDtypeStruct((n_splits, 8, 128), jnp.float32),
            jax.ShapeDtypeStruct((n_splits, 8, 128), jnp.float32),
        ),
        scratch_shapes=[
            pltpu.VMEM((B, tn), jnp.float32),  # l0 accumulator
            pltpu.VMEM((M, tn), jnp.float32),  # l2 accumulator
        ],
        compiler_params=pltpu.CompilerParams(
            dimension_semantics=("parallel", "arbitrary")),
    )(mu_arr, y, y_echo, f)

    inv_b = 1.0 / jnp.float32(B)
    pseudo_l0_loss = jnp.sum(l0_out[:, 0, 0]) * inv_b
    l2_loss = jnp.sum(l2_out[:, 0, 0]) * inv_b
    return pseudo_l0_loss, l2_loss


def _reference(y, y_echo, f, mu):
    y = y.astype(jnp.float32)
    y_echo = y_echo.astype(jnp.float32)
    f = f.astype(jnp.float32)
    ay = jnp.abs(y)
    l0 = jnp.sum((ay >= mu).astype(jnp.float32)
                 + jnp.logical_and(ay > 0, ay < mu).astype(jnp.float32) / mu * ay)
    diff = y_echo / 22.8 - f
    ad = jnp.abs(diff)
    l2 = jnp.trace(ad @ ad.T)
    b = y.shape[0]
    return l0 / b, l2 / b


if __name__ == "__main__":
    key = jax.random.PRNGKey(0)

    # (B, M, N): exercise the 2-way split path, the padded-remainder path,
    # and the single-tile path, with B != M in one case.
    configs = [(8, 8, 2048), (8, 16, 1100), (4, 8, 384)]

    for (B, M, N) in configs:
        kk = jax.random.fold_in(key, N)
        k1, k2, k3, k4 = jax.random.split(kk, 4)

        y = jax.random.normal(k1, (B, N), dtype=jnp.float32)
        # sprinkle exact zeros so the |y| > 0 branch is exercised
        y = y * (jax.random.uniform(k4, (B, N)) > 0.1).astype(jnp.float32)
        y_echo = jax.random.normal(k2, (M, N), dtype=jnp.float32) * 22.8
        f = jax.random.normal(k3, (M, N), dtype=jnp.float32)
        mu = 0.5

        l0, l2 = custom_loss(y, y_echo, f, mu)
        jax.block_until_ready((l0, l2))

        l0_ref, l2_ref = _reference(y, y_echo, f, mu)
        assert jnp.allclose(l0, l0_ref, rtol=1e-4, atol=1e-4), (l0, l0_ref)
        assert jnp.allclose(l2, l2_ref, rtol=1e-4, atol=1e-3), (l2, l2_ref)

    print("KERNEL_OK")
</pallas_src>

<mosaic_0001>
module attributes {stable_mosaic.version = 11 : i64} {
  func.func @_custom_loss_kernel(%arg0: i32, %arg1: i32, %arg2: memref<1x1xf32, #tpu.memory_space<smem>>, %arg3: memref<8x512xf32, #tpu.memory_space<vmem>>, %arg4: memref<8x512xf32, #tpu.memory_space<vmem>>, %arg5: memref<8x512xf32, #tpu.memory_space<vmem>>, %arg6: memref<1x8x128xf32, #tpu.memory_space<vmem>>, %arg7: memref<1x8x128xf32, #tpu.memory_space<vmem>>, %arg8: memref<8x512xf32, #tpu.memory_space<vmem>>, %arg9: memref<8x512xf32, #tpu.memory_space<vmem>>) attributes {dimension_semantics = [#tpu.dimension_semantics<parallel>, #tpu.dimension_semantics<arbitrary>], iteration_bounds = array<i64: 2, 2>, scalar_prefetch = 0 : i64, scratch_operands = 2 : i64, tpu.core_type = #tpu.core_type<tc>, window_params = [{transform_indices = @transform_0, window_bounds = array<i64: 1, 1>}, {transform_indices = @transform_1, window_bounds = array<i64: 8, 512>}, {transform_indices = @transform_2, window_bounds = array<i64: 8, 512>}, {transform_indices = @transform_3, window_bounds = array<i64: 8, 512>}, {transform_indices = @transform_4, window_bounds = array<i64: 1, 8, 128>}, {transform_indices = @transform_5, window_bounds = array<i64: 1, 8, 128>}]} {
    %c0_i32 = arith.constant 0 : i32
    %0 = arith.cmpi eq, %arg1, %c0_i32 : i32
    %1 = arith.extui %0 : i1 to i32
    %c0_i32_0 = arith.constant 0 : i32
    %2 = arith.cmpi ne, %1, %c0_i32_0 : i32
    scf.if %2 {
      %cst_19 = arith.constant 0.000000e+00 : f32
      %26 = vector.broadcast %cst_19 : f32 to vector<8x512xf32>
      %c0_20 = arith.constant 0 : index
      %c0_21 = arith.constant 0 : index
      %27 = vector.load %arg8[%c0_20, %c0_21] : memref<8x512xf32, #tpu.memory_space<vmem>>, vector<8x512xf32>
      tpu.vector_store %arg8[%c0_20, %c0_21], %26 {strides = array<i32>} : memref<8x512xf32, #tpu.memory_space<vmem>>, vector<8x512xf32>,
      %cst_22 = arith.constant 0.000000e+00 : f32
      %28 = vector.broadcast %cst_22 : f32 to vector<8x512xf32>
      %c0_23 = arith.constant 0 : index
      %c0_24 = arith.constant 0 : index
      %29 = vector.load %arg9[%c0_23, %c0_24] : memref<8x512xf32, #tpu.memory_space<vmem>>, vector<8x512xf32>
      tpu.vector_store %arg9[%c0_23, %c0_24], %28 {strides = array<i32>} : memref<8x512xf32, #tpu.memory_space<vmem>>, vector<8x512xf32>,
    } else {
    }
    %c0 = arith.constant 0 : index
    %c0_1 = arith.constant 0 : index
    %3 = memref.load %arg2[%c0, %c0_1] : memref<1x1xf32, #tpu.memory_space<smem>>
    %cst = arith.constant 1.000000e+00 : f32
    %4 = arith.divf %cst, %3 : f32
    %c0_2 = arith.constant 0 : index
    %c0_3 = arith.constant 0 : index
    %5 = vector.load %arg3[%c0_2, %c0_3] : memref<8x512xf32, #tpu.memory_space<vmem>>, vector<8x512xf32>
    %6 = math.absf %5 : vector<8x512xf32>
    %c0_4 = arith.constant 0 : index
    %c0_5 = arith.constant 0 : index
    %7 = vector.load %arg8[%c0_4, %c0_5] : memref<8x512xf32, #tpu.memory_space<vmem>>, vector<8x512xf32>
    %8 = vector.broadcast %4 : f32 to vector<8x512xf32>
    %9 = arith.mulf %6, %8 : vector<8x512xf32>
    %cst_6 = arith.constant 1.000000e+00 : f32
    %10 = vector.broadcast %cst_6 : f32 to vector<8x512xf32>
    %11 = arith.minimumf %9, %10 : vector<8x512xf32>
    %12 = arith.addf %7, %11 : vector<8x512xf32>
    %c0_7 = arith.constant 0 : index
    %c0_8 = arith.constant 0 : index
    %13 = vector.load %arg8[%c0_7, %c0_8] : memref<8x512xf32, #tpu.memory_space<vmem>>, vector<8x512xf32>
    tpu.vector_store %arg8[%c0_7, %c0_8], %12 {strides = array<i32>} : memref<8x512xf32, #tpu.memory_space<vmem>>, vector<8x512xf32>,
    %c0_9 = arith.constant 0 : index
    %c0_10 = arith.constant 0 : index
    %14 = vector.load %arg4[%c0_9, %c0_10] : memref<8x512xf32, #tpu.memory_space<vmem>>, vector<8x512xf32>
    %cst_11 = arith.constant 0.0438596494 : f32
    %15 = vector.broadcast %cst_11 : f32 to vector<8x512xf32>
    %16 = arith.mulf %14, %15 : vector<8x512xf32>
    %c0_12 = arith.constant 0 : index
    %c0_13 = arith.constant 0 : index
    %17 = vector.load %arg5[%c0_12, %c0_13] : memref<8x512xf32, #tpu.memory_space<vmem>>, vector<8x512xf32>
    %18 = arith.subf %16, %17 : vector<8x512xf32>
    %c0_14 = arith.constant 0 : index
    %c0_15 = arith.constant 0 : index
    %19 = vector.load %arg9[%c0_14, %c0_15] : memref<8x512xf32, #tpu.memory_space<vmem>>, vector<8x512xf32>
    %20 = arith.mulf %18, %18 : vector<8x512xf32>
    %21 = arith.addf %19, %20 : vector<8x512xf32>
    %c0_16 = arith.constant 0 : index
    %c0_17 = arith.constant 0 : index
    %22 = vector.load %arg9[%c0_16, %c0_17] : memref<8x512xf32, #tpu.memory_space<vmem>>, vector<8x512xf32>
    tpu.vector_store %arg9[%c0_16, %c0_17], %21 {strides = array<i32>} : memref<8x512xf32, #tpu.memory_space<vmem>>, vector<8x512xf32>,
    %c1_i32 = arith.constant 1 : i32
    %23 = arith.cmpi eq, %arg1, %c1_i32 : i32
    %24 = arith.extui %23 : i1 to i32
    %c0_i32_18 = arith.constant 0 : i32
    %25 = arith.cmpi ne, %24, %c0_i32_18 : i32
    scf.if %25 {
      %c0_19 = arith.constant 0 : index
      %c0_20 = arith.constant 0 : index
      %26 = vector.load %arg8[%c0_19, %c0_20] : memref<8x512xf32, #tpu.memory_space<vmem>>, vector<8x512xf32>
      %27 = vector.shape_cast %26 : vector<8x512xf32> to vector<1x8x512xf32>
      %cst_21 = arith.constant dense<0.000000e+00> : vector<1xf32>
      %28 = vector.multi_reduction <add>, %27, %cst_21 [1, 2] : vector<1x8x512xf32> to vector<1xf32>
      %29 = vector.shape_cast %28 : vector<1xf32> to vector<1x1x1xf32>
      %30 = vector.extract %29[0, 0, 0] : f32 from vector<1x1x1xf32>
      %31 = vector.broadcast %30 : f32 to vector<1x8x128xf32>
      %c0_22 = arith.constant 0 : index
      %c0_23 = arith.constant 0 : index
      %c0_24 = arith.constant 0 : index
      %32 = vector.load %arg6[%c0_22, %c0_23, %c0_24] : memref<1x8x128xf32, #tpu.memory_space<vmem>>, vector<1x8x128xf32>
      tpu.vector_store %arg6[%c0_22, %c0_23, %c0_24], %31 {strides = array<i32>} : memref<1x8x128xf32, #tpu.memory_space<vmem>>, vector<1x8x128xf32>,
      %c0_25 = arith.constant 0 : index
      %c0_26 = arith.constant 0 : index
      %33 = vector.load %arg9[%c0_25, %c0_26] : memref<8x512xf32, #tpu.memory_space<vmem>>, vector<8x512xf32>
      %34 = vector.shape_cast %33 : vector<8x512xf32> to vector<1x8x512xf32>
      %cst_27 = arith.constant dense<0.000000e+00> : vector<1xf32>
      %35 = vector.multi_reduction <add>, %34, %cst_27 [1, 2] : vector<1x8x512xf32> to vector<1xf32>
      %36 = vector.shape_cast %35 : vector<1xf32> to vector<1x1x1xf32>
      %37 = vector.extract %36[0, 0, 0] : f32 from vector<1x1x1xf32>
      %38 = vector.broadcast %37 : f32 to vector<1x8x128xf32>
      %c0_28 = arith.constant 0 : index
      %c0_29 = arith.constant 0 : index
      %c0_30 = arith.constant 0 : index
      %39 = vector.load %arg7[%c0_28, %c0_29, %c0_30] : memref<1x8x128xf32, #tpu.memory_space<vmem>>, vector<1x8x128xf32>
      tpu.vector_store %arg7[%c0_28, %c0_29, %c0_30], %38 {strides = array<i32>} : memref<1x8x128xf32, #tpu.memory_space<vmem>>, vector<1x8x128xf32>,
    } else {
    }
    return
  }
  func.func @transform_0(%arg0: i32, %arg1: i32) -> (i32, i32) {
    %c0_i32 = arith.constant 0 : i32
    %c0_i32_0 = arith.constant 0 : i32
    %c0_i32_1 = arith.constant 0 : i32
    return %c0_i32, %c0_i32_0 : i32, i32
  }
  func.func @transform_1(%arg0: i32, %arg1: i32) -> (i32, i32) {
    %c2_i32 = arith.constant 2 : i32
    %0 = arith.muli %arg0, %c2_i32 : i32
    %1 = arith.addi %0, %arg1 : i32
    %c0_i32 = arith.constant 0 : i32
    %c0_i32_0 = arith.constant 0 : i32
    return %c0_i32, %1 : i32, i32
  }
  func.func @transform_2(%arg0: i32, %arg1: i32) -> (i32, i32) {
    %c2_i32 = arith.constant 2 : i32
    %0 = arith.muli %arg0, %c2_i32 : i32
    %1 = arith.addi %0, %arg1 : i32
    %c0_i32 = arith.constant 0 : i32
    %c0_i32_0 = arith.constant 0 : i32
    return %c0_i32, %1 : i32, i32
  }
  func.func @transform_3(%arg0: i32, %arg1: i32) -> (i32, i32) {
    %c2_i32 = arith.constant 2 : i32
    %0 = arith.muli %arg0, %c2_i32 : i32
    %1 = arith.addi %0, %arg1 : i32
    %c0_i32 = arith.constant 0 : i32
    %c0_i32_0 = arith.constant 0 : i32
    return %c0_i32, %1 : i32, i32
  }
  func.func @transform_4(%arg0: i32, %arg1: i32) -> (i32, i32, i32) {
    %c0_i32 = arith.constant 0 : i32
    %c0_i32_0 = arith.constant 0 : i32
    %c0_i32_1 = arith.constant 0 : i32
    return %arg0, %c0_i32, %c0_i32_0 : i32, i32, i32
  }
  func.func @transform_5(%arg0: i32, %arg1: i32) -> (i32, i32, i32) {
    %c0_i32 = arith.constant 0 : i32
    %c0_i32_0 = arith.constant 0 : i32
    %c0_i32_1 = arith.constant 0 : i32
    return %arg0, %c0_i32, %c0_i32_0 : i32, i32, i32
  }
}

</mosaic_0001>

<bundles_post_ra>
// kernel: tpu_custom_call.1
= control target key start
LH: loop header
LB: loop body
LE: loop exit
PB: predicated region body
PF: predicated region fallthrough
CT: control target
= control target key end

     0   :  { %s1397_s0 = inlined_call_operand.<no memory space> [shape: f32[1,1], index: 0, kind: input, shape index: {}]   ;;  %s1398_s1 = inlined_call_operand.hbm [shape: f32[8,2048], index: 1, kind: input, shape index: {}]   ;;  %s1399_s2 = inlined_call_operand.hbm [shape: f32[8,2048], index: 2, kind: input, shape index: {}]   ;;  %s1400_s3 = inlined_call_operand.hbm [shape: f32[8,2048], index: 3, kind: input, shape index: {}]   ;;  %s1401_s4 = inlined_call_operand.hbm [shape: f32[2,8,128], index: 4, kind: output, shape index: {0}]   ;;  %s1402_s5 = inlined_call_operand.hbm [shape: f32[2,8,128], index: 5, kind: output, shape index: {1}]  }
   0x1   :  { %1409 = sst [smem:[#allocation25_spill]] %s1398_s1 }
   0x2   :  { %1410 = sst [smem:[#allocation26_spill]] %s1399_s2 }
   0x3   :  { %11 = sst [smem:[#allocation4]] %s1397_s0 }
   0x4   :  { %12 = vsyncpa [#allocation6], 0 }
   0x5   :  { %14 = vsyncpa [#allocation6 + $0x1], 0 }
   0x6   :  { %15 = vsyncpa [#allocation9], 0 }
   0x7   :  { %17 = vsyncpa [#allocation9 + $0x1], 0 }
   0x8   :  { %18 = vsyncpa [#allocation7], 0 }
   0x9   :  { %20 = vsyncpa [#allocation7 + $0x1], 0 }
   0xa   :  { %21 = vsyncpa [#allocation13], 0 }
   0xb   :  { %23 = vsyncpa [#allocation13 + $0x1], 0  ;;  %s1120_s20 = smov 0   ;;  %s1122_s21 = smov 0  }
   0xc   :  { %s1124_s22 = smov 0   ;;  %s1126_s23 = smov 0  }
   0xd   :  { %s1128_s24 = smov 0   ;;  %s1130_s25 = smov 0  }
   0xe   :  { %s1132_s0 = smov 0   ;;  %s1134_s26 = smov 0  }
   0xf   :  { %s1136_s27 = smov 0   ;;  %s1138_s28 = smov 0  }
  0x10   :  { %s1140_s29 = smov 0  }
  0x11 LB: > { %1411 = sst [smem:[#allocation18_spill]] %s1047_s22  ;;  %s1174_s30 = sadd.s32 4294967295, %s1079_s29   ;;  %s1079_s29 = sphi %s1140_s29, %s29_s29   ;;  %s1075_s28 = sphi %s1138_s28, %s1433_s28   ;;  %s1071_s27 = sphi %s1136_s27, %s1432_s27   ;;  %s1067_s26 = sphi %s1134_s26, %s1431_s26   ;;  %s1063_s0 = sphi %s1132_s0, %s1430_s0   ;;  %s1059_s25 = sphi %s1130_s25, %s1438_s25   ;;  %s1055_s24 = sphi %s1128_s24, %s1437_s24   ;;  %s1051_s23 = sphi %s1126_s23, %s1436_s23   ;;  %s1047_s22 = sphi %s1124_s22, %s1428_s22   ;;  %s1043_s21 = sphi %s1122_s21, %s1435_s21   ;;  %s1039_s20 = sphi %s1120_s20, %s1434_s20  }
  0x12   : > { %1412 = sst [smem:[#allocation19_spill]] %s1071_s27  ;;  %s677_s6 = sadd.s32 4294967294, %s1079_s29  }
  0x13   : > { %1413 = sst [smem:[#allocation20_spill]] %s1075_s28  ;;  %s38_s7 = sadd.s32 1, %s1071_s27 }
  0x14   : > { %s41_s8 = sadd.s32 1, %s1075_s28  ;;  %p39_p0 = scmp.ge.s32.totalorder %s38_s7, 2 }
  0x15   : > { %s678_s9 = sshll.u32 %s1075_s28, 1  ;;  %s73_s11 = sadd.s32 1, %s1059_s25 }
  0x16   : > { %s1181_s10 = sadd.s32 %s1071_s27, %s678_s9  ;;  %s1440_s7 = smov (%p39_p0, %s38_s7), 0 }
  0x17   : > { %1414 = sst [smem:[#allocation21_spill]] %s1440_s7  ;;  %s1442_s8 = smov (!%p39_p0, %s41_s8), %s1075_s28 }
  0x18   : > { %p80_p1 = scmp.ne.s32.totalorder %s1059_s25, %s1055_s24  ;;  %p81_p2 = scmp.eq.s32.totalorder %s1079_s29, 0 }
  0x19   : > { %p43_p3 = scmp.ge.s32.totalorder %s1442_s8, 2  ;;  %p86_p4 = scmp.ne.s32.totalorder %s1055_s24, %s1051_s23 }
  0x1a   : > { %p1191_p5 = por %p81_p2, %p80_p1  ;;  %p87_p6 = scmp.eq.s32.totalorder %s1174_s30, 0 }
  0x1b   : > { %s1444_s8 = smov (%p43_p3, %s1442_s8), 0  ;;  %s159_s14 = sadd.s32 1, %s1047_s22 }
  0x1c   : > { %1416 = sst [smem:[#allocation22_spill]] %s1444_s8  ;;  %p1198_p7 = por %p87_p6, %p86_p4 }
  0x1d   : > { %s679_s15 = sshll.u32 %s1444_s8, 1  ;;  %s156_s16 = ssub.s32 %s1075_s28, %s1444_s8 }
  0x1e   : > { %s69_s17 = sadd.s32 %s679_s15, %s1440_s7  ;;  %p157_p8 = scmp.eq.s32.totalorder %s156_s16, 0 }
  0x1f   : > { %s70_s18 = ssub.s32 %s1181_s10, %s69_s17  ;;  %p169_p9 = scmp.ne.s32.totalorder %s1047_s22, %s1043_s21 }
  0x20   : > { %p71_p10 = scmp.eq.s32.totalorder %s70_s18, 0  ;;  %p170_p11 = scmp.eq.s32.totalorder %s1174_s30, 3 }
  0x21   : > { %s1212_s19 = scalar_select %p157_p8, %s1047_s22, %s159_s14  }
  0x22   : > { %s1215_s23 = scalar_select %p71_p10, %s1059_s25, %s73_s11  }
  0x23   : > { %1418 = sst [smem:[#allocation23_spill]] %s1212_s19  ;;  %p1217_p12 = por %p170_p11, %p169_p9 }
  0x24   : > { %1419 = sst [smem:[#allocation24_spill]] %s1215_s23  ;;  %p175_p13 = scmp.ne.s32.totalorder %s1043_s21, %s1039_s20 }
  0x25   : > { %p176_p0 = scmp.eq.s32.totalorder %s677_s6, 3  ;;  %p748_p1 = scmp.lt.s32.totalorder %s1079_s29, 4 }
  0x26   : > { %s1407_s15 = sand.u32 1, %s1059_s25   ;;  %s1236_s14 = sshll.u32 %s1181_s10, 9 }
  0x27   : > { %p1227_p2 = por %p176_p0, %p175_p13  ;;  %s1233_s17 = sshll.u32 %s1407_s15, 5 }
  0x28   : > { %p1240_p3 = pnand %p748_p1, %p1191_p5  ;;  %s246_s6 = sand.u32 1, %s1079_s29  }
  0x29   : > { %s1423_s2 = sld [smem:[#allocation26_spill]]  ;;  %s250_s28 = scalar_lea.vmem [#allocation8], %s1233_s17 }
  0x2a   : > { %s260_s27 = sshll.u32 %s250_s28, 4  ;;  %p698_p4 = scmp.ge.s32.totalorder %s1079_s29, 1  ;;  %s261_s27 = int_to_ptr.vmem [resolvable:$true] %s260_s27 }
  0x2b   : > { %s1251_s15 = scalar_lea.sflag [#allocation9], %s246_s6  ;;  %p843_p6 = pneg %p1240_p3 }
  0x2c   : > { %s854_s10 = scalar_lea.vmem %s261_s27, 512  ;;  %s1081_s12 = smov [#allocation8]  }
  0x2d   : > { %p855_p5 = scmp.ne.s32.totalorder %s261_s27, %s854_s10  ;;  %s859_s23 = sshll.u32 %s1081_s12, 4  ;;  %s860_s23 = int_to_ptr.vmem [resolvable:$false] %s859_s23 }
  0x2e   : > { %s861_s19 = scalar_lea.vmem %s860_s23, 1024  ;;  %p862_p10 = scmp.lt.s32.totalorder %s261_s27, %s860_s23 }
  0x2f   : > { %s258_s7 = scalar_lea.hbm %s1423_s2, %s1236_s14  ;;  %p857_p8 = pnand %p855_p5, %p843_p6 }
  0x30   : > { %p863_p11 = scmp.lt.s32.totalorder %s861_s19, %s854_s10 }
  0x31   : > { %p858_p9 = pneg %p857_p8 }
  0x32   : > { %p864_p13 = por %p863_p11, %p862_p10 }
  0x34   : > { %p865_p0 = pnand %p864_p13, %p858_p9 }
  0x36   : > { %868 = shalt.err (!%p865_p0)
}
  0x37   : > { %737 = dma.hbm_to_vmem [thread:$0]  (!%p1240_p3), %s258_s7, 512, %s261_s27, %s1251_s15  }
  0x38   : > { %p286_p1 = scmp.lt.s32.totalorder %s1079_s29, 5  ;;  %s1425_s1 = sld [smem:[#allocation25_spill]] }
  0x39   : > { %s229_s6 = scalar_lea.vmem [#allocation5], %s1233_s17  ;;  %s1426_s10 = sand.u32 1, %s1059_s25  }
  0x3a   : > { %p1264_p5 = pnand %p698_p4, %p286_p1  ;;  %s239_s18 = sshll.u32 %s229_s6, 4  ;;  %s240_s18 = int_to_ptr.vmem [resolvable:$true] %s239_s18 }
  0x3b   : > { %s226_s12 = scalar_lea.sflag [#allocation6], %s1426_s10  ;;  %s882_s2 = scalar_lea.vmem %s240_s18, 512 }
  0x3c   : > { %p883_p8 = scmp.ne.s32.totalorder %s240_s18, %s882_s2  ;;  %s1082_s27 = smov [#allocation5]  }
  0x3d   : > { %s887_s7 = sshll.u32 %s1082_s27, 4  ;;  %s888_s7 = int_to_ptr.vmem [resolvable:$false] %s887_s7 }
  0x3e   : > { %s237_s23 = scalar_lea.hbm %s1425_s1, %s1236_s14  ;;  %p885_p9 = pnand %p883_p8, %p843_p6 }
  0x3f   : > { %s889_s22 = scalar_lea.vmem %s888_s7, 1024  ;;  %p890_p4 = scmp.lt.s32.totalorder %s240_s18, %s888_s7 }
  0x40   : > { %p886_p10 = pneg %p885_p9  ;;  %p891_p11 = scmp.lt.s32.totalorder %s889_s22, %s882_s2 }
  0x42   : > { %p892_p13 = por %p891_p11, %p890_p4 }
  0x44   : > { %p893_p0 = pnand %p892_p13, %p886_p10 }
  0x46   : > { %896 = shalt.err (!%p893_p0)
}
  0x47   : > { %734 = dma.hbm_to_vmem [thread:$0]  (!%p1240_p3), %s237_s23, 512, %s240_s18, %s226_s12  }
  0x48   : > { %s279_s6 = scalar_lea.hbm %s1400_s3, %s1236_s14  ;;  %s271_s10 = scalar_lea.vmem [#allocation10], %s1233_s17 }
  0x49   : > { %s281_s1 = sshll.u32 %s271_s10, 4  ;;  %s1083_s2 = smov [#allocation10]   ;;  %s282_s1 = int_to_ptr.vmem [resolvable:$true] %s281_s1 }
  0x4a   : > { %s910_s27 = scalar_lea.vmem %s282_s1, 512  ;;  %s915_s22 = sshll.u32 %s1083_s2, 4  ;;  %s916_s22 = int_to_ptr.vmem [resolvable:$false] %s915_s22 }
  0x4b   : > { %p911_p1 = scmp.ne.s32.totalorder %s282_s1, %s910_s27  ;;  %s917_s7 = scalar_lea.vmem %s916_s22, 1024 }
  0x4c   : > { %p918_p10 = scmp.lt.s32.totalorder %s282_s1, %s916_s22  ;;  %p919_p4 = scmp.lt.s32.totalorder %s917_s7, %s910_s27 }
  0x4d   : > { %p913_p8 = pnand %p911_p1, %p843_p6 }
  0x4e   : > { %p920_p11 = por %p919_p4, %p918_p10 }
  0x4f   : > { %p914_p9 = pneg %p913_p8 }
  0x51   : > { %p921_p13 = pnand %p920_p11, %p914_p9 }
  0x53   : > { %924 = shalt.err (!%p921_p13)
}
  0x54   : > { %740 = dma.hbm_to_vmem [thread:$0]  (!%p1240_p3), %s279_s6, 512, %s282_s1, %s1251_s15  }
  0x55   : > { %290 = sbr.rel (%p1264_p5) target bundleno = 451 (0x1c3), region = 36  ;;  %s292_s17 = sand.u32 (!%p1264_p5), 1, %s1055_s24  }
  0x56   : > { %s699_s14 = sshll.u32 (!%p1264_p5), %s292_s17, 5  ;;  %s293_s23 = scalar_lea.sflag (!%p1264_p5), [#allocation6], %s292_s17 }
  0x57   : > { %s1294_s18 = scalar_lea.vmem (!%p1264_p5), [#allocation5], %s699_s14 }
  0x5a   : > { %1022 = dma.done.wait (%p1198_p7), %s293_s23, 512  }
  0x5b   : > { %1024 = vsyncadd (%p1198_p7), %s293_s23, 4294966784  ;;  %s301_s11 = sand.u32 1, %s1174_s30   ;;  %s305_s1 = scalar_lea.vmem [#allocation8], %s699_s14 }
  0x5c   : > { %s302_s12 = scalar_lea.sflag [#allocation9], %s301_s11 }
  0x5d   : > { %1026 = dma.done.wait (%p1198_p7), %s302_s12, 1024  }
  0x5e   : > { %1028 = vsyncadd (%p1198_p7), %s302_s12, 4294966272  ;;  %s1306_s15 = sand.u32 1, %s1043_s21   ;;  %s314_s8 = scalar_lea.vmem [#allocation10], %s699_s14 }
  0x5f   : > { %s702_s28 = sshll.u32 %s1306_s15, 3  ;;  %p704_p3 = scmp.ne.s32.totalorder %s1063_s0, 0 }
  0x60   : > { %s1309_s19 = scalar_lea.vmem [#allocation11], %s702_s28  ;;  %s1311_s6 = scalar_lea.vmem [#allocation12], %s702_s28 }
  0x61   : > { %368 = sbr.rel (%p704_p3) target bundleno = 107 (0x6b), region = 52 }
  0x66   : > { %v1084_v0 = vmov 0.0  }
  0x67   : > { %369 = vst [vmem:[#allocation2 + $0x10] sm:$0xff] %v1084_v0  ;;  %370 = vst [vmem:[#allocation2] sm:$0xff] %v1084_v0 }
  0x68   : > { %371 = vst [vmem:[#allocation2 + $0x18] sm:$0xff] %v1084_v0  ;;  %372 = vst [vmem:[#allocation2 + $0x8] sm:$0xff] %v1084_v0 }
  0x69   : > { %373 = vst [vmem:[#allocation3] sm:$0xff] %v1084_v0  ;;  %374 = vst [vmem:[#allocation3 + $0x18] sm:$0xff] %v1084_v0 }
  0x6a   : > { %375 = vst [vmem:[#allocation3 + $0x8] sm:$0xff] %v1084_v0  ;;  %376 = vst [vmem:[#allocation3 + $0x10] sm:$0xff] %v1084_v0 }
  0x6b PF: > { %s377_s30 = sld [smem:[#allocation4]]  ;;  %v410_v1 = vld [vmem:[%s305_s1] sm:$0xff]  ;;  %v411_v2 = vld [vmem:[%s305_s1 + $0x8] sm:$0xff]  ;;  %v412_v3 = vld [vmem:[%s305_s1 + $0x10] sm:$0xff]  ;;  %p705_p7 = scmp.ne.s32.totalorder %s1063_s0, 1 }
  0x6c   : > { %v413_v4 = vld [vmem:[%s305_s1 + $0x18] sm:$0xff]  ;;  %v414_v5 = vmul.f32 0.04385965, %v410_v1  ;;  %v415_v6 = vmul.f32 0.04385965, %v411_v2  ;;  %v418_v9 = vld [vmem:[%s314_s8] sm:$0xff] }
  0x6d   : > { %v416_v7 = vmul.f32 0.04385965, %v412_v3  ;;  %v417_v8 = vmul.f32 0.04385965, %v413_v4  ;;  %v419_v10 = vld [vmem:[%s314_s8 + $0x8] sm:$0xff]  ;;  %v420_v12 = vld [vmem:[%s314_s8 + $0x10] sm:$0xff] }
  0x6e   : > { %v421_v13 = vld [vmem:[%s314_s8 + $0x18] sm:$0xff]  ;;  %v422_v14 = vsub.f32 %v414_v5, %v418_v9  ;;  %v423_v15 = vsub.f32 %v415_v6, %v419_v10  ;;  %v381_v31 = vld [vmem:[%s1294_s18] sm:$0xff]  ;;  %v382_v32 = vld [vmem:[%s1294_s18 + $0x8] sm:$0xff] }
  0x6f   : > { %v424_v16 = vsub.f32 %v416_v7, %v420_v12  ;;  %v425_v17 = vsub.f32 %v417_v8, %v421_v13  ;;  %v383_v33 = vld [vmem:[%s1294_s18 + $0x10] sm:$0xff]  ;;  %v384_v34 = vld [vmem:[%s1294_s18 + $0x18] sm:$0xff]  ;;  %v385_v35 = vand.u32 2147483647, %v381_v31  ;;  %v386_v36 = vand.u32 2147483647, %v382_v32 }
  0x70   : > { %v426_v18 = vld [vmem:[#allocation3] sm:$0xff]  ;;  %v427_v19 = vld [vmem:[#allocation3 + $0x18] sm:$0xff]  ;;  %v430_v22 = vmul.f32 %v422_v14, %v422_v14  ;;  %v431_v23 = vmul.f32 %v423_v15, %v423_v15  ;;  %v387_v37 = vand.u32 2147483647, %v383_v33  ;;  %v388_v38 = vand.u32 2147483647, %v384_v34 }
  0x71   : > { %v378_v11 = vstv %s377_s30  ;;  %v428_v20 = vld [vmem:[#allocation3 + $0x8] sm:$0xff]  ;;  %v429_v21 = vld [vmem:[#allocation3 + $0x10] sm:$0xff]  ;;  %v432_v24 = vmul.f32 %v424_v16, %v424_v16  ;;  %v433_v25 = vmul.f32 %v425_v17, %v425_v17  ;;  %v390_v45 = vld [vmem:[#allocation2] sm:$0xff] }
  0x72   : > { %839 = vrcp.f32 %v378_v11  ;;  %v434_v26 = vadd.f32 %v430_v22, %v426_v18  ;;  %v435_v27 = vadd.f32 %v431_v23, %v427_v19  ;;  %v389_v40 = vld [vmem:[#allocation2 + $0x10] sm:$0xff]  ;;  %v391_v46 = vld [vmem:[#allocation2 + $0x18] sm:$0xff]  ;;  %v392_v47 = vld [vmem:[#allocation2 + $0x8] sm:$0xff] }
  0x73   : > { %v436_v28 = vadd.f32 %v432_v24, %v428_v20  ;;  %v437_v29 = vadd.f32 %v433_v25, %v429_v21 }
  0x74   : > { %438 = vst [vmem:[#allocation3] sm:$0xff] %v434_v26  ;;  %439 = vst [vmem:[#allocation3 + $0x18] sm:$0xff] %v435_v27 }
  0x75   : > { %440 = vst [vmem:[#allocation3 + $0x8] sm:$0xff] %v436_v28  ;;  %441 = vst [vmem:[#allocation3 + $0x10] sm:$0xff] %v437_v29 }
  0x7f   : > { %v840_v30 = vpop.eup %839 }
  0x80   : > { %715 = vpush %v840_v30 }
  0xb1   : > { %s716_s13 = spop %715 }
  0xb2   : > { %v393_v39 = vstv %s716_s13 }
  0xb3   : > { %v394_v41 = vmul.f32 %v393_v39, %v385_v35  ;;  %v395_v42 = vmul.f32 %v393_v39, %v386_v36  ;;  %v396_v43 = vmul.f32 %v393_v39, %v387_v37  ;;  %v397_v44 = vmul.f32 %v393_v39, %v388_v38 }
  0xb5   : > { %v398_v48 = vmin.f32 %v394_v41, 1.0  ;;  %v399_v49 = vmin.f32 %v395_v42, 1.0  ;;  %v400_v50 = vmin.f32 %v396_v43, 1.0  ;;  %v401_v51 = vmin.f32 %v397_v44, 1.0 }
  0xb6   : > { %445 = sbr.rel (%p705_p7) target bundleno = 405 (0x195), region = 56 }
  0xb7   : > { %v402_v52 = vadd.f32 %v398_v48, %v389_v40  ;;  %v403_v53 = vadd.f32 %v399_v49, %v390_v45  ;;  %v404_v54 = vadd.f32 %v400_v50, %v391_v46  ;;  %v405_v55 = vadd.f32 %v401_v51, %v392_v47 }
  0xb9   : > { %406 = vst [vmem:[#allocation2 + $0x10] sm:$0xff] %v402_v52  ;;  %407 = vst [vmem:[#allocation2] sm:$0xff] %v403_v53 }
  0xba   : > { %408 = vst [vmem:[#allocation2 + $0x18] sm:$0xff] %v404_v54  ;;  %409 = vst [vmem:[#allocation2 + $0x8] sm:$0xff] %v405_v55 }
  0xbb   : > { %v464_v60 = vld [vmem:[#allocation3] sm:$0xff]  ;;  %v465_v61 = vld [vmem:[#allocation3 + $0x18] sm:$0xff]  ;;  %v466_v63 = vld [vmem:[#allocation3 + $0x8] sm:$0xff] }
  0xbc   : > { %v468_v0 = vadd.f32 %v465_v61, %v464_v60  ;;  %v467_v2 = vld [vmem:[#allocation3 + $0x10] sm:$0xff] }
  0xbe   : > { %v469_v3 = vadd.f32 %v468_v0, %v466_v63 }
  0xc0   : > { %v446_v56 = vld [vmem:[#allocation2 + $0x10] sm:$0xff]  ;;  %v447_v57 = vld [vmem:[#allocation2] sm:$0xff]  ;;  %v470_v5 = vadd.f32 %v469_v3, %v467_v2 }
  0xc1   : > { %v448_v58 = vld [vmem:[#allocation2 + $0x18] sm:$0xff]  ;;  %v450_v59 = vadd.f32 %v447_v57, %v446_v56  ;;  %v449_v62 = vld [vmem:[#allocation2 + $0x8] sm:$0xff] }
  0xc3   : > { %v451_v1 = vadd.f32 %v450_v59, %v448_v58 }
  0xc5   : > { %v452_v4 = vadd.f32 %v451_v1, %v449_v62 }
  0xc7   : > { %453 = vadd.xlane.f32.xlu0 %v452_v4 }
  0xcb   : > { %471 = vadd.xlane.f32.xlu0 %v470_v5 }
 0x150   : > { %v454_v6 = vpop.xlane.xlu0 %453 }
 0x151   : > { %v455_v7 = vrot.slane %v454_v6, 4 }
 0x153   : > { %v456_v8 = vadd.f32 %v455_v7, %v454_v6 }
 0x154   : > { %v472_v9 = vpop.xlane.xlu0 %471 }
 0x155   : > { %v457_v10 = vrot.slane %v456_v8, 2  ;;  %v473_v11 = vrot.slane %v472_v9, 4 }
 0x157   : > { %v474_v12 = vadd.f32 %v473_v11, %v472_v9  ;;  %v458_v13 = vadd.f32 %v457_v10, %v456_v8 }
 0x159   : > { %v475_v14 = vrot.slane %v474_v12, 2  ;;  %v459_v15 = vrot.slane %v458_v13, 1 }
 0x15b   : > { %v476_v16 = vadd.f32 %v475_v14, %v474_v12  ;;  %v460_v17 = vadd.f32 %v459_v15, %v458_v13 }
 0x15d   : > { %717 = vpush %v460_v17  ;;  %v477_v18 = vrot.slane %v476_v16, 1 }
 0x15f   : > { %v478_v19 = vadd.f32 %v477_v18, %v476_v16 }
 0x161   : > { %719 = vpush %v478_v19 }
 0x18e   : > { %s718_s0 = spop %717 }
 0x18f   : > { %v462_v20 = vstv %s718_s0 }
 0x190   : > { %463 = vst [vmem:[%s1309_s19] sm:$0xff] %v462_v20 }
 0x192   : > { %s720_s10 = spop %719 }
 0x193   : > { %v480_v21 = vstv %s720_s10 }
 0x194   : > { %481 = vst [vmem:[%s1311_s6] sm:$0xff] %v480_v21 }
 0x195 PF: > { %s708_s27 = sshll.u32 %s1067_s26, 7  ;;  %s501_s17 = sshll.u32 %s1309_s19, 4  ;;  %s502_s17 = int_to_ptr.vmem [resolvable:$true] %s501_s17 }
 0x196   : > { %s499_s7 = scalar_lea.hbm %s1401_s4, %s708_s27  ;;  %s483_s14 = scalar_lea.sflag [#allocation7], %s1306_s15 }
 0x197   : > { %s925_s23 = scalar_lea.vmem %s502_s17, 128  ;;  %s1085_s18 = smov [#allocation11]  }
 0x198   : > { %p926_p6 = scmp.ne.s32.totalorder %s502_s17, %s925_s23  ;;  %s929_s11 = sshll.u32 %s1085_s18, 4  ;;  %s930_s11 = int_to_ptr.vmem [resolvable:$false] %s929_s11 }
 0x199   : > { %s931_s12 = scalar_lea.vmem %s930_s11, 256  ;;  %p932_p1 = scmp.lt.s32.totalorder %s502_s17, %s930_s11 }
 0x19a   : > { %p927_p5 = pnand %p926_p6, %p1217_p12  ;;  %p933_p8 = scmp.lt.s32.totalorder %s931_s12, %s925_s23 }
 0x19c   : > { %p928_p0 = pneg %p927_p5  ;;  %p934_p9 = por %p933_p8, %p932_p1 }
 0x19e   : > { %p935_p10 = pnand %p934_p9, %p928_p0 }
 0x1a0   : > { %938 = shalt.err (!%p935_p10)
}
 0x1a1   : > { %s939_s1 = scalar_lea.hbm %s499_s7, 128  ;;  %s943_s19 = scalar_lea.hbm %s1401_s4, 256 }
 0x1a2   : > { %p940_p4 = scmp.ne.s32.totalorder %s499_s7, %s939_s1  ;;  %p944_p3 = scmp.lt.s32.totalorder %s499_s7, %s1401_s4 }
 0x1a3   : > { %p945_p7 = scmp.lt.s32.totalorder %s943_s19, %s939_s1 }
 0x1a4   : > { %p941_p11 = pnand %p940_p4, %p1217_p12 }
 0x1a5   : > { %p946_p6 = por %p945_p7, %p944_p3 }
 0x1a6   : > { %p942_p13 = pneg %p941_p11 }
 0x1a8   : > { %p947_p5 = pnand %p946_p6, %p942_p13 }
 0x1aa   : > { %950 = shalt.err (!%p947_p5)
}
 0x1ab   : > { %727 = dma.vmem_to_hbm [thread:$0]  (%p1217_p12), %s502_s17, 128, %s499_s7, %s483_s14  }
 0x1ac   : > { %s512_s2 = scalar_lea.hbm %s1402_s5, %s708_s27  ;;  %s514_s22 = sshll.u32 %s1311_s6, 4  ;;  %s515_s22 = int_to_ptr.vmem [resolvable:$true] %s514_s22 }
 0x1ad   : > { %s488_s23 = scalar_lea.sflag [#allocation13], %s1306_s15  ;;  %s951_s18 = scalar_lea.vmem %s515_s22, 128 }
 0x1ae   : > { %p952_p0 = scmp.ne.s32.totalorder %s515_s22, %s951_s18  ;;  %s1086_s11 = smov [#allocation12]  }
 0x1af   : > { %s955_s12 = sshll.u32 %s1086_s11, 4  ;;  %s956_s12 = int_to_ptr.vmem [resolvable:$false] %s955_s12 }
 0x1b0   : > { %p953_p1 = pnand %p952_p0, %p1217_p12  ;;  %s957_s1 = scalar_lea.vmem %s956_s12, 256 }
 0x1b1   : > { %p958_p9 = scmp.lt.s32.totalorder %s515_s22, %s956_s12  ;;  %p959_p10 = scmp.lt.s32.totalorder %s957_s1, %s951_s18 }
 0x1b2   : > { %p954_p8 = pneg %p953_p1 }
 0x1b3   : > { %p960_p4 = por %p959_p10, %p958_p9 }
 0x1b5   : > { %p961_p11 = pnand %p960_p4, %p954_p8 }
 0x1b7   : > { %964 = shalt.err (!%p961_p11)
}
 0x1b8   : > { %s965_s26 = scalar_lea.hbm %s512_s2, 128  ;;  %s969_s27 = scalar_lea.hbm %s1402_s5, 256 }
 0x1b9   : > { %p966_p13 = scmp.ne.s32.totalorder %s512_s2, %s965_s26  ;;  %p970_p6 = scmp.lt.s32.totalorder %s512_s2, %s1402_s5 }
 0x1ba   : > { %p971_p5 = scmp.lt.s32.totalorder %s969_s27, %s965_s26 }
 0x1bb   : > { %p967_p3 = pnand %p966_p13, %p1217_p12 }
 0x1bc   : > { %p972_p0 = por %p971_p5, %p970_p6 }
 0x1bd   : > { %p968_p7 = pneg %p967_p3 }
 0x1bf   : > { %p973_p1 = pnand %p972_p0, %p968_p7 }
 0x1c1   : > { %976 = shalt.err (!%p973_p1)
}
 0x1c2   : > { %728 = dma.vmem_to_hbm [thread:$0]  (%p1217_p12), %s515_s22, 128, %s512_s2, %s488_s23  }
 0x1c3 PF: > { %p749_p8 = scmp.ge.s32.totalorder %s1079_s29, 2  ;;  %s526_s14 = sand.u32 1, %s1039_s20  }
 0x1c4   : > { %s527_s28 = scalar_lea.sflag [#allocation7], %s526_s14 }
 0x1c5   : > { %p742_p9 = pnand %p749_p8, %p1227_p2 }
 0x1c7   : > { %p743_p10 = pneg %p742_p9 }
 0x1c9   : > { %1030 = dma.done.wait (%p743_p10), %s527_s28, 128  }
 0x1ca   : > { %1032 = vsyncadd (%p743_p10), %s527_s28, 4294967168  ;;  %s536_s8 = scalar_lea.sflag [#allocation13], %s526_s14 }
 0x1cb   : > { %1034 = dma.done.wait (%p743_p10), %s536_s8, 128  }
 0x1cc   : > { %1036 = vsyncadd (%p743_p10), %s536_s8, 4294967168  ;;  %s29_s29 = sadd.s32 1, %s1079_s29   ;;  %s1427_s9 = sld [smem:[#allocation18_spill]] }
 0x1cd   : > { %p26_p4 = scmp.ge.s32.totalorder %s29_s29, 6   ;;  %s1428_s22 = sld [smem:[#allocation23_spill]] }
 0x1ce   : > { %s1429_s19 = sld [smem:[#allocation24_spill]]  ;;  %s1434_s20 = smov %s1043_s21 }
 0x1cf   : > { %s1430_s0 = sld [smem:[#allocation19_spill]]  ;;  %s1436_s23 = smov %s1055_s24 }
 0x1d0   : > { %s1431_s26 = sld [smem:[#allocation20_spill]]  ;;  %s1437_s24 = smov %s1059_s25 }
 0x1d1   : > { %s1432_s27 = sld [smem:[#allocation21_spill]]  ;;  %28 = sbr.rel (!%p26_p4) target bundleno = 17 (0x11), region = 130 }
 0x1d2   : > { %s1433_s28 = sld [smem:[#allocation22_spill]]  ;;  %s1435_s21 = smov %s1427_s9 }
 0x1d4   : > { %s1438_s25 = smov %s1429_s19 }
 0x1d6   :  { %541 = vsyncpa [#allocation6], 1 }
 0x1d7   :  { %543 = vsyncpa [#allocation6 + $0x1], 1 }
 0x1d8   :  { %544 = vsyncpa [#allocation9], 1 }
 0x1d9   :  { %546 = vsyncpa [#allocation9 + $0x1], 1 }
 0x1da   :  { %547 = vsyncpa [#allocation7], 1 }
 0x1db   :  { %549 = vsyncpa [#allocation7 + $0x1], 1 }
 0x1dc   :  { %550 = vsyncpa [#allocation13], 1 }
 0x1dd   :  { %552 = vsyncpa [#allocation13 + $0x1], 1 }

</bundles_post_ra>
